<compile_context>
chip_gen: v5e
topology: v5e:2x2
jax: 0.10.0
libtpu: 0.0.40
codegen_flags: <defaults>
</compile_context>

<pallas_src>
import jax
import jax.numpy as jnp
from jax.experimental import pallas as pl
from jax.experimental.pallas import tpu as pltpu


_LANE = 128
_X_BLOCK_BYTES = 1 << 20  # ~1 MiB per x block -> in+out double-buffered ~4 MiB
_MAX_BBLK = 8             # cap static unroll over the batch block


def _residual_kernel(x_ref, w_ref, b_ref, o_ref):
    # x_ref : (Bblk, C, TILE_L)  batch block x length tile (L on lanes)
    # w_ref : (C, C)             Conv1d weight (C_out, C_in), VMEM-resident
    # b_ref : (C, 1)             bias, broadcasts over the lane (L) axis
    # o_ref : (Bblk, C, TILE_L)
    w = w_ref[...]
    b = b_ref[...]
    for i in range(x_ref.shape[0]):                 # static, small unroll
        x = x_ref[i]                                # (C, TILE_L)
        y = jnp.dot(w, x, preferred_element_type=jnp.float32) + b
        o_ref[i] = (y + x.astype(jnp.float32)).astype(o_ref.dtype)  # fn(x)+x


def _pick_tiles(B, C, L, itemsize):
    """Choose (Bblk, TILE_L). L must already be a multiple of 128."""
    # Largest lane-dense TILE_L (multiple of 128) dividing L, capped so one
    # x block stays <= _X_BLOCK_BYTES (keeps double-buffered working set tiny
    # on all generations, incl. v5e's 16 MiB scoped default).
    max_l = max(_LANE, (_X_BLOCK_BYTES // (C * itemsize)) // _LANE * _LANE)
    tile_l = _LANE
    t = min(L, max_l)
    while t >= _LANE:
        if L % t == 0:
            tile_l = t
            break
        t -= _LANE
    # Small-L regime: one tile spans all of L -> merge batch elements per step.
    bblk = 1
    if tile_l == L:
        budget = max(1, _X_BLOCK_BYTES // (C * L * itemsize))
        for cand in range(min(B, budget, _MAX_BBLK), 0, -1):
            if B % cand == 0:
                bblk = cand
                break
    return bblk, tile_l


def residual_pointwise_conv(x_ncl, weight, bias):
    """Fused Residual(Conv1d(C, C, 1)) forward.

    x_ncl : (B, C, L) float32   (PyTorch NCL layout, used as-is)
    weight: (C, C)              (C_out, C_in) pointwise conv weight
    bias  : (C,)
    returns (B, C, L)
    """
    B, C, L = x_ncl.shape
    itemsize = jnp.dtype(x_ncl.dtype).itemsize

    # Ragged L: pad to a multiple of 128 so every block is lane-dense and no
    # single block can blow past VMEM; padded tail is sliced off afterwards.
    L_pad = ((L + _LANE - 1) // _LANE) * _LANE
    x_in = x_ncl if L_pad == L else jnp.pad(
        x_ncl, ((0, 0), (0, 0), (0, L_pad - L)))

    bblk, tile_l = _pick_tiles(B, C, L_pad, itemsize)
    grid = (B // bblk, L_pad // tile_l)
    b2d = bias.reshape(C, 1)  # channel on sublanes, broadcast over lanes

    cost = pl.CostEstimate(
        flops=2 * B * C * C * L_pad,
        transcendentals=0,
        bytes_accessed=2 * B * C * L_pad * itemsize + (C * C + C) * itemsize,
    )

    out = pl.pallas_call(
        _residual_kernel,
        out_shape=jax.ShapeDtypeStruct((B, C, L_pad), x_in.dtype),
        grid=grid,
        in_specs=[
            pl.BlockSpec((bblk, C, tile_l), lambda b, l: (b, 0, l)),  # x tile
            pl.BlockSpec((C, C), lambda b, l: (0, 0)),                # weight
            pl.BlockSpec((C, 1), lambda b, l: (0, 0)),                # bias
        ],
        out_specs=pl.BlockSpec((bblk, C, tile_l), lambda b, l: (b, 0, l)),
        # Output reuses x's HBM buffer (each tile is fully read before its
        # output tile is stored).  Pair with donate_argnums at the jit
        # boundary so XLA does not insert a defensive copy.
        input_output_aliases={0: 0},
        compiler_params=pltpu.CompilerParams(
            dimension_semantics=("parallel", "parallel")),
        cost_estimate=cost,
    )(x_in, weight, b2d)

    if L_pad != L:
        out = out[:, :, :L]
    return out


if __name__ == "__main__":
    key = jax.random.PRNGKey(0)
    kx, kw, kb = jax.random.split(key, 3)

    B, C, L = 2, 32, 256  # small NCL shapes; L a multiple of 128 (lane-dense)
    x = jax.random.normal(kx, (B, C, L), dtype=jnp.float32)
    # Deterministic parameter init for fn = Conv1d(C, C, kernel_size=1)
    weight = jax.random.normal(kw, (C, C), dtype=jnp.float32) * 0.05
    bias = jax.random.normal(kb, (C,), dtype=jnp.float32) * 0.05

    # Pure-JAX reference: fn(x) + x, computed BEFORE the kernel (x is donated).
    ref = jnp.einsum("oc,bcl->bol", weight, x) + bias[None, :, None] + x
    ref = jax.block_until_ready(ref)

    # donate_argnums=0 makes input_output_aliases copy-free; x is invalidated
    # after this call and must not be used again.
    run = jax.jit(residual_pointwise_conv, donate_argnums=0)
    out = jax.block_until_ready(run(x, weight, bias))

    assert out.shape == (B, C, L)
    assert jnp.allclose(out, ref, atol=1e-4, rtol=1e-4)

    print("KERNEL_OK")
</pallas_src>

<mosaic_0001>
module attributes {stable_mosaic.version = 11 : i64} {
  func.func @_residual_kernel(%arg0: i32, %arg1: i32, %arg2: memref<2x32x256xf32, #tpu.memory_space<vmem>>, %arg3: memref<32x32xf32, #tpu.memory_space<vmem>>, %arg4: memref<32x1xf32, #tpu.memory_space<vmem>>, %arg5: memref<2x32x256xf32, #tpu.memory_space<vmem>>) attributes {dimension_semantics = [#tpu.dimension_semantics<parallel>, #tpu.dimension_semantics<parallel>], iteration_bounds = array<i64: 1, 1>, scalar_prefetch = 0 : i64, scratch_operands = 0 : i64, tpu.core_type = #tpu.core_type<tc>, window_params = [{transform_indices = @transform_0, window_bounds = array<i64: 2, 32, 256>}, {pipeline_mode = #tpu.pipeline_mode<synchronous>, transform_indices = @transform_1, window_bounds = array<i64: 32, 32>}, {pipeline_mode = #tpu.pipeline_mode<synchronous>, transform_indices = @transform_2, window_bounds = array<i64: 32, 1>}, {transform_indices = @transform_3, window_bounds = array<i64: 2, 32, 256>}]} {
    %c0 = arith.constant 0 : index
    %c0_0 = arith.constant 0 : index
    %0 = vector.load %arg3[%c0, %c0_0] : memref<32x32xf32, #tpu.memory_space<vmem>>, vector<32x32xf32>
    %c0_1 = arith.constant 0 : index
    %c0_2 = arith.constant 0 : index
    %1 = vector.load %arg4[%c0_1, %c0_2] : memref<32x1xf32, #tpu.memory_space<vmem>>, vector<32x1xf32>
    %c0_3 = arith.constant 0 : index
    %c0_4 = arith.constant 0 : index
    %c0_5 = arith.constant 0 : index
    %2 = vector.load %arg2[%c0_3, %c0_4, %c0_5] : memref<2x32x256xf32, #tpu.memory_space<vmem>>, vector<1x32x256xf32>
    %3 = vector.shape_cast %2 : vector<1x32x256xf32> to vector<32x256xf32>
    %cst = arith.constant dense<0.000000e+00> : vector<32x256xf32>
    %4 = tpu.matmul %0, %3, %cst {dimension_numbers = #tpu.dot_dimension_numbers<[1], [0], [0], [1], [0, 0, 1, 1], [], []>} : vector<32x32xf32>, vector<32x256xf32>, vector<32x256xf32> -> vector<32x256xf32>
    %5 = vector.broadcast %1 : vector<32x1xf32> to vector<32x256xf32>
    %6 = arith.addf %4, %5 : vector<32x256xf32>
    %7 = arith.addf %6, %3 : vector<32x256xf32>
    %c0_6 = arith.constant 0 : index
    %c0_7 = arith.constant 0 : index
    %c0_8 = arith.constant 0 : index
    %8 = vector.load %arg5[%c0_6, %c0_7, %c0_8] : memref<2x32x256xf32, #tpu.memory_space<vmem>>, vector<1x32x256xf32>
    %9 = vector.shape_cast %8 : vector<1x32x256xf32> to vector<32x256xf32>
    %10 = vector.shape_cast %7 : vector<32x256xf32> to vector<1x32x256xf32>
    tpu.vector_store %arg5[%c0_6, %c0_7, %c0_8], %10 {strides = array<i32>} : memref<2x32x256xf32, #tpu.memory_space<vmem>>, vector<1x32x256xf32>,
    %c1 = arith.constant 1 : index
    %c0_9 = arith.constant 0 : index
    %c0_10 = arith.constant 0 : index
    %11 = vector.load %arg2[%c1, %c0_9, %c0_10] : memref<2x32x256xf32, #tpu.memory_space<vmem>>, vector<1x32x256xf32>
    %12 = vector.shape_cast %11 : vector<1x32x256xf32> to vector<32x256xf32>
    %cst_11 = arith.constant dense<0.000000e+00> : vector<32x256xf32>
    %13 = tpu.matmul %0, %12, %cst_11 {dimension_numbers = #tpu.dot_dimension_numbers<[1], [0], [0], [1], [0, 0, 1, 1], [], []>} : vector<32x32xf32>, vector<32x256xf32>, vector<32x256xf32> -> vector<32x256xf32>
    %14 = vector.broadcast %1 : vector<32x1xf32> to vector<32x256xf32>
    %15 = arith.addf %13, %14 : vector<32x256xf32>
    %16 = arith.addf %15, %12 : vector<32x256xf32>
    %c1_12 = arith.constant 1 : index
    %c0_13 = arith.constant 0 : index
    %c0_14 = arith.constant 0 : index
    %17 = vector.load %arg5[%c1_12, %c0_13, %c0_14] : memref<2x32x256xf32, #tpu.memory_space<vmem>>, vector<1x32x256xf32>
    %18 = vector.shape_cast %17 : vector<1x32x256xf32> to vector<32x256xf32>
    %19 = vector.shape_cast %16 : vector<32x256xf32> to vector<1x32x256xf32>
    tpu.vector_store %arg5[%c1_12, %c0_13, %c0_14], %19 {strides = array<i32>} : memref<2x32x256xf32, #tpu.memory_space<vmem>>, vector<1x32x256xf32>,
    return
  }
  func.func @transform_0(%arg0: i32, %arg1: i32) -> (i32, i32, i32) {
    %c0_i32 = arith.constant 0 : i32
    %c0_i32_0 = arith.constant 0 : i32
    return %arg0, %c0_i32, %arg1 : i32, i32, i32
  }
  func.func @transform_1(%arg0: i32, %arg1: i32) -> (i32, i32) {
    %c0_i32 = arith.constant 0 : i32
    %c0_i32_0 = arith.constant 0 : i32
    %c0_i32_1 = arith.constant 0 : i32
    return %c0_i32, %c0_i32_0 : i32, i32
  }
  func.func @transform_2(%arg0: i32, %arg1: i32) -> (i32, i32) {
    %c0_i32 = arith.constant 0 : i32
    %c0_i32_0 = arith.constant 0 : i32
    %c0_i32_1 = arith.constant 0 : i32
    return %c0_i32, %c0_i32_0 : i32, i32
  }
  func.func @transform_3(%arg0: i32, %arg1: i32) -> (i32, i32, i32) {
    %c0_i32 = arith.constant 0 : i32
    %c0_i32_0 = arith.constant 0 : i32
    return %arg0, %c0_i32, %arg1 : i32, i32, i32
  }
}

</mosaic_0001>

<bundles_post_ra>
// kernel: residual_pointwise_conv.1
= control target key start
LH: loop header
LB: loop body
LE: loop exit
PB: predicated region body
PF: predicated region fallthrough
CT: control target
= control target key end

     0   :  { %8 = vsyncpa [#allocation3], 0  ;;  %s457_s0 = inlined_call_operand.hbm [shape: f32[2,32,256], index: 0, kind: input, shape index: {}, may-alias: {0,3}]   ;;  %s458_s1 = inlined_call_operand.vmem [shape: f32[32,32], index: 1, kind: input, shape index: {}]   ;;  %s459_s2 = inlined_call_operand.vmem [shape: f32[32,1], index: 2, kind: input, shape index: {}]   ;;  %s460_s3 = inlined_call_operand.hbm [shape: f32[2,32,256], index: 3, kind: output, shape index: {}, may-alias: {0,3}]  }
   0x1   :  { %9 = vsyncpa [#allocation4], 0  ;;  %s14_s14 = sshll.u32 %s457_s0, 4  ;;  %s332_s15 = smov [#allocation2]   ;;  %s15_s14 = int_to_ptr.hbm [resolvable:$true] %s14_s14 }
   0x2   :  { %s16_s16 = sshll.u32 %s332_s15, 4  ;;  %s333_s17 = smov 256   ;;  %s17_s16 = int_to_ptr.vmem [resolvable:$true] %s16_s16 }
   0x3   :  { %s334_s18 = smov 16  }
   0x4   :  { %22 = dma.hbm_to_vmem [thread:$0]  %s15_s14, 2048, %s17_s16, [#allocation3], %s333_s17, %s333_s17, %s334_s18  }
   0x5   :  { %328 = dma.done.wait [#allocation3], 2048  }
   0x6   :  { %329 = vsyncadd [#allocation3], 4294965248  ;;  %v335_v0 = vmov 0   ;;  %v363_v1 = vld [vmem:[#allocation2 + $0x30] sm:$0xff]  ;;  %v365_v2 = vld [vmem:[#allocation2 + $0x38] sm:$0xff]  ;;  %vm67_vm0 = vcmask 261120  }
   0x7   :  { %278 = vset.pattern.permute.xlu0 %v335_v0  ;;  %279 = vset.pattern.permute.xlu1 %v335_v0  ;;  %v367_v3 = vld [vmem:[#allocation2 + $0x70] sm:$0xff]  ;;  %v371_v4 = vld [vmem:[#allocation2 + $0x78] sm:$0xff]  ;;  %v373_v5 = vld [vmem:[#allocation2 + $0x20] sm:$0xff]  ;;  %s244_s9 = sshll.u32 %s460_s3, 4  ;;  %s245_s9 = int_to_ptr.hbm [resolvable:$true] %s244_s9 }
   0x8   :  { %92 = vmatpush.msra.mxu0 %v363_v1  ;;  %121 = vmatpush.msra.mxu1 %v365_v2  ;;  %v375_v6 = vld [vmem:[#allocation2 + $0x28] sm:$0xff]  ;;  %v379_v7 = vld [vmem:[#allocation2 + $0x60] sm:$0xff]  ;;  %v383_v9 = vld [vmem:[#allocation2 + $0x10] sm:$0xff] }
   0x9   :  { %175 = vmatpush.msra.mxu2 %v367_v3  ;;  %204 = vmatpush.msra.mxu3 %v371_v4  ;;  %v381_v8 = vld [vmem:[#allocation2 + $0x68] sm:$0xff]  ;;  %v387_v10 = vld [vmem:[#allocation2 + $0x18] sm:$0xff]  ;;  %v389_v11 = vld [vmem:[#allocation2 + $0x50] sm:$0xff] }
   0xa   :  { %93 = vmatpush.msra.mxu0 %v373_v5  ;;  %122 = vmatpush.msra.mxu1 %v375_v6  ;;  %v391_v12 = vld [vmem:[#allocation2 + $0x58] sm:$0xff]  ;;  %v39_v13 = vld [vmem:[#allocation2] sm:$0xff]  ;;  %v40_v14 = vld [vmem:[#allocation2 + $0x8] sm:$0xff] }
   0xb   :  { %176 = vmatpush.msra.mxu2 %v379_v7  ;;  %205 = vmatpush.msra.mxu3 %v381_v8  ;;  %v155_v15 = vld [vmem:[#allocation2 + $0x40] sm:$0xff]  ;;  %v156_v16 = vld [vmem:[#allocation2 + $0x48] sm:$0xff]  ;;  %v37_v19 = vld [vmem:[%s459_s2 + $0x10] sm:$0xff] }
   0xc   :  { %94 = vmatpush.msra.mxu0 %v383_v9  ;;  %123 = vmatpush.msra.mxu1 %v387_v10  ;;  %v31_v17 = vld [vmem:[%s458_s1] sm:$0xff]  ;;  %v32_v20 = vld [vmem:[%s458_s1 + $0x8] sm:$0xff]  ;;  %v38_v22 = vld [vmem:[%s459_s2 + $0x18] sm:$0xff] }
   0xd   :  { %177 = vmatpush.msra.mxu2 %v389_v11  ;;  %206 = vmatpush.msra.mxu3 %v391_v12  ;;  %v35_v18 = vld [vmem:[%s459_s2] sm:$0xff]  ;;  %v36_v21 = vld [vmem:[%s459_s2 + $0x8] sm:$0xff]  ;;  %v33_v23 = vld [vmem:[%s458_s1 + $0x10] sm:$0xff] }
   0xe   :  { %95 = vmatpush.msra.mxu0 %v39_v13  ;;  %124 = vmatpush.msra.mxu1 %v40_v14  ;;  %v34_v24 = vld [vmem:[%s458_s1 + $0x18] sm:$0xff]  ;;  %s336_s1 = smov [#allocation5]  }
   0xf   :  { %178 = vmatpush.msra.mxu2 %v155_v15  ;;  %207 = vmatpush.msra.mxu3 %v156_v16  ;;  %s242_s6 = sshll.u32 %s336_s1, 4  ;;  %s243_s6 = int_to_ptr.vmem [resolvable:$true] %s242_s6 }
  0x10   :  { %257 = vmatmul.msk.f32.vlgmr.msra.gmra.mxu0 %vm67_vm0, %v31_v17  ;;  %261 = vmatmul.msk.f32.vlgmr.msra.gmra.mxu1 %vm67_vm0, %v31_v17 }
  0x11   :  { %265 = vmatmul.msk.f32.vlgmr.msra.gmra.mxu2 %vm67_vm0, %v31_v17  ;;  %269 = vmatmul.msk.f32.vlgmr.msra.gmra.mxu3 %vm67_vm0, %v31_v17 }
  0x12   :  { %49 = vperm.xlu0 %278, %v35_v18   ;;  %59 = vperm.xlu1 %279, %v37_v19  }
  0x18   :  { %258 = vmatmul.msk.f32.gmra.mxu0 %vm67_vm0, %v32_v20  ;;  %262 = vmatmul.msk.f32.gmra.mxu1 %vm67_vm0, %v32_v20 }
  0x19   :  { %266 = vmatmul.msk.f32.gmra.mxu2 %vm67_vm0, %v32_v20  ;;  %270 = vmatmul.msk.f32.gmra.mxu3 %vm67_vm0, %v32_v20 }
  0x1a   :  { %54 = vperm.xlu0 %278, %v36_v21   ;;  %64 = vperm.xlu1 %279, %v38_v22  }
  0x20   :  { %259 = vmatmul.msk.f32.gmra.mxu0 %vm67_vm0, %v33_v23  ;;  %263 = vmatmul.msk.f32.gmra.mxu1 %vm67_vm0, %v33_v23 }
  0x21   :  { %267 = vmatmul.msk.f32.gmra.mxu2 %vm67_vm0, %v33_v23  ;;  %271 = vmatmul.msk.f32.gmra.mxu3 %vm67_vm0, %v33_v23 }
  0x28   :  { %260 = vmatmul.msk.f32.gmra.mxu0 %vm67_vm0, %v34_v24  ;;  %264 = vmatmul.msk.f32.gmra.mxu1 %vm67_vm0, %v34_v24 }
  0x29   :  { %268 = vmatmul.msk.f32.gmra.mxu2 %vm67_vm0, %v34_v24  ;;  %272 = vmatmul.msk.f32.gmra.mxu3 %vm67_vm0, %v34_v24 }
  0x84   :  { %v50_v25 = vpop.permute.xlu0 %49  ;;  %v60_v45 = vpop.permute.xlu1 %59 }
  0x8c   :  { %v55_v32 = vpop.permute.xlu0 %54  ;;  %v65_v58 = vpop.permute.xlu1 %64 }
  0x8d   :  { %v97_v26 = vpop.f32.mrf.mxu0  ;;  %v126_v27 = vpop.f32.mrf.mxu1 }
  0x8e   :  { %v98_v28 = vadd.f32 %v97_v26, %v50_v25  ;;  %v127_v29 = vadd.f32 %v126_v27, %v50_v25 }
  0x90   :  { %v138_v30 = vadd.f32 %v98_v28, %v39_v13  ;;  %v139_v31 = vadd.f32 %v127_v29, %v40_v14 }
  0x92   :  { %146 = vst [vmem:[#allocation5] sm:$0xff] %v138_v30 }
  0x93   :  { %147 = vst [vmem:[#allocation5 + $0x8] sm:$0xff] %v139_v31 }
  0x94   :  { %v180_v33 = vpop.f32.mrf.mxu2  ;;  %v209_v34 = vpop.f32.mrf.mxu3 }
  0x95   :  { %v181_v35 = vadd.f32 %v180_v33, %v50_v25  ;;  %v210_v36 = vadd.f32 %v209_v34, %v50_v25  ;;  %v100_v37 = vpop.f32.mrf.mxu0  ;;  %v129_v38 = vpop.f32.mrf.mxu1 }
  0x96   :  { %v101_v39 = vadd.f32 %v100_v37, %v55_v32  ;;  %v130_v40 = vadd.f32 %v129_v38, %v55_v32 }
  0x97   :  { %v221_v41 = vadd.f32 %v181_v35, %v155_v15  ;;  %v222_v42 = vadd.f32 %v210_v36, %v156_v16 }
  0x98   :  { %v140_v43 = vadd.f32 %v101_v39, %v383_v9  ;;  %v141_v44 = vadd.f32 %v130_v40, %v387_v10 }
  0x99   :  { %230 = vst [vmem:[#allocation5 + $0x40] sm:$0xff] %v221_v41 }
  0x9a   :  { %231 = vst [vmem:[#allocation5 + $0x48] sm:$0xff] %v222_v42 }
  0x9b   :  { %148 = vst [vmem:[#allocation5 + $0x10] sm:$0xff] %v140_v43 }
  0x9c   :  { %149 = vst [vmem:[#allocation5 + $0x18] sm:$0xff] %v141_v44  ;;  %v183_v46 = vpop.f32.mrf.mxu2  ;;  %v212_v47 = vpop.f32.mrf.mxu3 }
  0x9d   :  { %v184_v48 = vadd.f32 %v183_v46, %v55_v32  ;;  %v213_v49 = vadd.f32 %v212_v47, %v55_v32  ;;  %v103_v50 = vpop.f32.mrf.mxu0  ;;  %v132_v51 = vpop.f32.mrf.mxu1 }
  0x9e   :  { %v104_v52 = vadd.f32 %v103_v50, %v60_v45  ;;  %v133_v53 = vadd.f32 %v132_v51, %v60_v45 }
  0x9f   :  { %v223_v54 = vadd.f32 %v184_v48, %v389_v11  ;;  %v224_v55 = vadd.f32 %v213_v49, %v391_v12 }
  0xa0   :  { %v142_v56 = vadd.f32 %v104_v52, %v373_v5  ;;  %v143_v57 = vadd.f32 %v133_v53, %v375_v6 }
  0xa1   :  { %232 = vst [vmem:[#allocation5 + $0x50] sm:$0xff] %v223_v54 }
  0xa2   :  { %233 = vst [vmem:[#allocation5 + $0x58] sm:$0xff] %v224_v55 }
  0xa3   :  { %150 = vst [vmem:[#allocation5 + $0x20] sm:$0xff] %v142_v56 }
  0xa4   :  { %151 = vst [vmem:[#allocation5 + $0x28] sm:$0xff] %v143_v57  ;;  %v186_v59 = vpop.f32.mrf.mxu2  ;;  %v215_v60 = vpop.f32.mrf.mxu3 }
  0xa5   :  { %v187_v61 = vadd.f32 %v186_v59, %v60_v45  ;;  %v216_v62 = vadd.f32 %v215_v60, %v60_v45  ;;  %v106_v63 = vpop.f32.mrf.mxu0  ;;  %v135_v0 = vpop.f32.mrf.mxu1 }
  0xa6   :  { %v107_v9 = vadd.f32 %v106_v63, %v65_v58  ;;  %v136_v10 = vadd.f32 %v135_v0, %v65_v58 }
  0xa7   :  { %v225_v11 = vadd.f32 %v187_v61, %v379_v7  ;;  %v226_v12 = vadd.f32 %v216_v62, %v381_v8 }
  0xa8   :  { %v144_v5 = vadd.f32 %v107_v9, %v363_v1  ;;  %v145_v6 = vadd.f32 %v136_v10, %v365_v2 }
  0xa9   :  { %234 = vst [vmem:[#allocation5 + $0x60] sm:$0xff] %v225_v11 }
  0xaa   :  { %235 = vst [vmem:[#allocation5 + $0x68] sm:$0xff] %v226_v12 }
  0xab   :  { %152 = vst [vmem:[#allocation5 + $0x30] sm:$0xff] %v144_v5 }
  0xac   :  { %153 = vst [vmem:[#allocation5 + $0x38] sm:$0xff] %v145_v6  ;;  %v189_v13 = vpop.f32.mrf.mxu2  ;;  %v218_v14 = vpop.f32.mrf.mxu3 }
  0xad   :  { %v190_v15 = vadd.f32 %v189_v13, %v65_v58  ;;  %v219_v16 = vadd.f32 %v218_v14, %v65_v58 }
  0xaf   :  { %v227_v7 = vadd.f32 %v190_v15, %v367_v3  ;;  %v228_v1 = vadd.f32 %v219_v16, %v371_v4 }
  0xb1   :  { %236 = vst [vmem:[#allocation5 + $0x70] sm:$0xff] %v227_v7 }
  0xb2   :  { %237 = vst [vmem:[#allocation5 + $0x78] sm:$0xff] %v228_v1 }
  0xb3   :  { %250 = dma.vmem_to_hbm [thread:$0]  %s243_s6, 2048, %s245_s9, [#allocation4], %s333_s17, %s333_s17, %s334_s18  }
  0xb4   :  { %330 = dma.done.wait [#allocation4], 2048  }
  0xb5   :  { %331 = vsyncadd [#allocation4], 4294965248 }
  0xb6   :  { %255 = vsyncpa [#allocation3], 1 }
  0xb7   :  { %256 = vsyncpa [#allocation4], 1 }

</bundles_post_ra>
